<compile_context>
chip_gen: v5e
topology: v5e:2x2
jax: 0.10.0
libtpu: 0.0.40
codegen_flags: <defaults>
</compile_context>

<pallas_src>
import functools

import numpy as np
import jax
import jax.numpy as jnp
from jax.experimental import pallas as pl
from jax.experimental.pallas import tpu as pltpu


def mha_kernel(x_ref, mask_ref, wqkg_ref, wo_ref, o_ref, *, heads):
    # x_ref:    (1, seq, FP)   one batch element, feature dim zero-padded to 128*k
    # mask_ref: (1, 1, seq)    f32 key mask (1.0 where id_box == k, else 0.0)
    # wqkg_ref: (FP, QKGP)     [Wq^T | Wk^T | Wg^T], zero-padded, lane-dense
    # wo_ref:   (F, FP)        Wo^T, output dim zero-padded, lane-dense
    # o_ref:    (1, seq, FP)   f32 output (lane-dense store)
    seq = x_ref.shape[1]
    F = wo_ref.shape[0]
    d_k = F // heads
    scale = jnp.float32(1.0 / np.sqrt(d_k))
    cdt = wqkg_ref.dtype                      # MXU operand dtype (f32 or bf16)

    x = x_ref[0]                              # (seq, FP)

    # One fused, lane-dense projection matmul; f32 accumulation on the MXU.
    qkg = jnp.dot(x, wqkg_ref[...], preferred_element_type=jnp.float32)  # (seq, QKGP)

    q = qkg[:, 0 * F:1 * F] * scale           # fold 1/sqrt(d_k) into q   (seq, F)
    k = qkg[:, 1 * F:2 * F]
    g = qkg[:, 2 * F:3 * F]

    # Per-head views (heads, seq, d_k); heads are contracted back out below.
    qh = q.reshape(seq, heads, d_k).transpose(1, 0, 2)
    kh = k.reshape(seq, heads, d_k).transpose(1, 0, 2)
    gh = g.reshape(seq, heads, d_k).transpose(1, 0, 2)

    # Scores for all heads at once; contraction on the last dims -> no explicit .T.
    s = jnp.einsum("hqd,hkd->hqk", qh.astype(cdt), kh.astype(cdt),
                   preferred_element_type=jnp.float32)          # (heads, seq, seq)

    # Exact masked_fill semantics (matches torch, incl. fully-masked rows).
    s = jnp.where(mask_ref[...] > 0.5, jnp.float32(-1e9), s)

    # Softmax over keys — exact f32 math (no approximate reciprocal).
    s = s - jnp.max(s, axis=-1, keepdims=True)
    e = jnp.exp(s)
    p = e / jnp.sum(e, axis=-1, keepdims=True)

    sc = jnp.einsum("hqk,hkd->hqd", p.astype(cdt), gh.astype(cdt),
                    preferred_element_type=jnp.float32)         # (heads, seq, d_k)

    # Head concat folded into one output matmul: (seq, F) @ (F, FP), lane-dense store.
    concat = sc.transpose(1, 0, 2).reshape(seq, F)
    o_ref[0] = jnp.dot(concat.astype(cdt), wo_ref[...],
                       preferred_element_type=jnp.float32)


def multi_head_attention(features, id_box, k_id, params, heads, *,
                         mxu_dtype=jnp.bfloat16):
    bs, seq, F = features.shape
    assert F % heads == 0
    FP = ((F + 127) // 128) * 128            # lane-dense feature dim
    QKGP = ((3 * F + 127) // 128) * 128      # lane-dense fused Q|K|G output dim
    pad_f = FP - F

    # f32 key mask (1.0 = masked); int compare done once in the wrapper.
    mask = (id_box == k_id).astype(jnp.float32).reshape(bs, 1, seq)

    # Fused lane-dense projection weight [Wq^T | Wk^T | Wg^T] : (FP, QKGP).
    w_qkg = jnp.concatenate(
        [params["wq"].T, params["wk"].T, params["wg"].T], axis=1)        # (F, 3F)
    w_qkg = jnp.pad(w_qkg, ((0, pad_f), (0, QKGP - 3 * F))).astype(mxu_dtype)

    # Output projection Wo^T with padded (lane-dense) output dim: (F, FP).
    w_o = jnp.pad(params["wo"].T, ((0, 0), (0, pad_f))).astype(mxu_dtype)

    x_p = jnp.pad(features, ((0, 0), (0, 0), (0, pad_f))).astype(mxu_dtype)

    out_p = pl.pallas_call(
        functools.partial(mha_kernel, heads=heads),
        out_shape=jax.ShapeDtypeStruct((bs, seq, FP), jnp.float32),
        grid=(bs,),
        in_specs=[
            pl.BlockSpec((1, seq, FP), lambda b: (b, 0, 0)),   # features (padded)
            pl.BlockSpec((1, 1, seq), lambda b: (b, 0, 0)),    # f32 key mask
            pl.BlockSpec((FP, QKGP), lambda b: (0, 0)),        # fused Wqkg^T (constant)
            pl.BlockSpec((F, FP), lambda b: (0, 0)),           # Wo^T (constant)
        ],
        out_specs=pl.BlockSpec((1, seq, FP), lambda b: (b, 0, 0)),
        compiler_params=pltpu.CompilerParams(
            dimension_semantics=("parallel",),       # bs=2 -> both v7x TensorCores busy
            vmem_limit_bytes=32 * 1024 * 1024,       # safe everywhere; raise on v5e/v6e
        ),
    )(x_p, mask, w_qkg, w_o)

    return out_p[..., :F]


def reference(features, id_box, k_id, params, heads):
    """Pure-JAX re-implementation of the PyTorch forward for validation."""
    bs, seq, F = features.shape
    d_k = F // heads
    lin = lambda x, w: x @ w.T  # nn.Linear(bias=False)

    def split(x):  # (bs, seq, F) -> (bs, heads, seq, d_k)
        return x.reshape(bs, seq, heads, d_k).transpose(0, 2, 1, 3)

    q = split(lin(features, params["wq"]))
    kk = split(lin(features, params["wk"]))
    g = split(lin(features, params["wg"]))

    w = jnp.einsum("bhqd,bhkd->bhqk", q, kk) / np.sqrt(d_k)
    msk = (id_box == k_id)[:, None, None, :]           # (bs, 1, 1, seq)
    w = jnp.where(msk, -1e9, w)
    p = jax.nn.softmax(w, axis=-1)
    score = jnp.einsum("bhqk,bhkd->bhqd", p, g)
    concat = score.transpose(0, 2, 1, 3).reshape(bs, seq, F)
    return lin(concat, params["wo"])


def xavier_normal(key, out_f, in_f):
    std = float(np.sqrt(2.0 / (in_f + out_f)))
    return std * jax.random.normal(key, (out_f, in_f), dtype=jnp.float32)


if __name__ == "__main__":
    bs, seq, heads, in_features = 2, 8, 4, 32
    k_id = 1

    root = jax.random.PRNGKey(0)
    kq, kk_, kg, ko, kx, kid = jax.random.split(root, 6)

    params = {
        "wq": xavier_normal(kq, in_features, in_features),
        "wk": xavier_normal(kk_, in_features, in_features),
        "wg": xavier_normal(kg, in_features, in_features),
        "wo": xavier_normal(ko, in_features, in_features),
    }
    features = jax.random.normal(kx, (bs, seq, in_features), dtype=jnp.float32)
    id_box = jax.random.randint(kid, (bs, seq), 0, 3, dtype=jnp.int32)

    ref = reference(features, id_box, k_id, params, heads)

    # f32 MXU path — matches the PyTorch module's numerics (exact softmax).
    out_f32 = multi_head_attention(features, id_box, k_id, params, heads,
                                   mxu_dtype=jnp.float32)
    out_f32 = jax.block_until_ready(out_f32)
    np.testing.assert_allclose(np.asarray(out_f32), np.asarray(ref),
                               rtol=2e-3, atol=2e-3)

    # Default bf16 MXU path (v5e/v6e/v7x throughput; softmax math stays f32) —
    # reduced-precision sanity band.
    out_bf16 = multi_head_attention(features, id_box, k_id, params, heads)
    out_bf16 = jax.block_until_ready(out_bf16)
    np.testing.assert_allclose(np.asarray(out_bf16), np.asarray(ref),
                               rtol=1e-1, atol=1e-1)

    print("KERNEL_OK")
</pallas_src>

<mosaic_0001>
module attributes {stable_mosaic.version = 11 : i64} {
  func.func @mha_kernel(%arg0: i32, %arg1: memref<1x8x128xf32, #tpu.memory_space<vmem>>, %arg2: memref<1x1x8xf32, #tpu.memory_space<vmem>>, %arg3: memref<128x128xf32, #tpu.memory_space<vmem>>, %arg4: memref<32x128xf32, #tpu.memory_space<vmem>>, %arg5: memref<1x8x128xf32, #tpu.memory_space<vmem>>) attributes {dimension_semantics = [#tpu.dimension_semantics<parallel>], iteration_bounds = array<i64: 2>, scalar_prefetch = 0 : i64, scratch_operands = 0 : i64, tpu.core_type = #tpu.core_type<tc>, window_params = [{transform_indices = @transform_0, window_bounds = array<i64: 1, 8, 128>}, {transform_indices = @transform_1, window_bounds = array<i64: 1, 1, 8>}, {pipeline_mode = #tpu.pipeline_mode<synchronous>, transform_indices = @transform_2, window_bounds = array<i64: 128, 128>}, {pipeline_mode = #tpu.pipeline_mode<synchronous>, transform_indices = @transform_3, window_bounds = array<i64: 32, 128>}, {transform_indices = @transform_4, window_bounds = array<i64: 1, 8, 128>}]} {
    %c0 = arith.constant 0 : index
    %c0_0 = arith.constant 0 : index
    %c0_1 = arith.constant 0 : index
    %0 = vector.load %arg1[%c0, %c0_0, %c0_1] : memref<1x8x128xf32, #tpu.memory_space<vmem>>, vector<1x8x128xf32>
    %1 = vector.shape_cast %0 : vector<1x8x128xf32> to vector<8x128xf32>
    %c0_2 = arith.constant 0 : index
    %c0_3 = arith.constant 0 : index
    %2 = vector.load %arg3[%c0_2, %c0_3] : memref<128x128xf32, #tpu.memory_space<vmem>>, vector<128x128xf32>
    %cst = arith.constant dense<0.000000e+00> : vector<8x128xf32>
    %3 = tpu.matmul %1, %2, %cst {dimension_numbers = #tpu.dot_dimension_numbers<[1], [0], [0], [1], [0, 0, 1, 1], [], []>} : vector<8x128xf32>, vector<128x128xf32>, vector<8x128xf32> -> vector<8x128xf32>
    %4 = vector.extract_strided_slice %3 {offsets = [0, 0], sizes = [8, 32], strides = [1, 1]} : vector<8x128xf32> to vector<8x32xf32>
    %cst_4 = arith.constant 0.353553385 : f32
    %5 = vector.broadcast %cst_4 : f32 to vector<8x32xf32>
    %6 = arith.mulf %4, %5 : vector<8x32xf32>
    %7 = vector.extract_strided_slice %3 {offsets = [0, 32], sizes = [8, 32], strides = [1, 1]} : vector<8x128xf32> to vector<8x32xf32>
    %8 = vector.extract_strided_slice %3 {offsets = [0, 64], sizes = [8, 32], strides = [1, 1]} : vector<8x128xf32> to vector<8x32xf32>
    %9 = vector.shape_cast %6 : vector<8x32xf32> to vector<8x4x8xf32>
    %10 = tpu.transpose %9, [1, 0, 2] : vector<8x4x8xf32> -> vector<4x8x8xf32>
    %11 = vector.shape_cast %7 : vector<8x32xf32> to vector<8x4x8xf32>
    %12 = tpu.transpose %11, [1, 0, 2] : vector<8x4x8xf32> -> vector<4x8x8xf32>
    %13 = vector.shape_cast %8 : vector<8x32xf32> to vector<8x4x8xf32>
    %14 = tpu.transpose %13, [1, 0, 2] : vector<8x4x8xf32> -> vector<4x8x8xf32>
    "tpu.trace_start"() <{level = 10 : i32, message = "hqd,hkd->hqk"}> : () -> ()
    %cst_5 = arith.constant dense<0.000000e+00> : vector<4x8x8xf32>
    %15 = tpu.matmul %10, %12, %cst_5 {dimension_numbers = #tpu.dot_dimension_numbers<[2], [2], [1], [1], [0, 0, 0, 1, 1, 1], [0], [0]>} : vector<4x8x8xf32>, vector<4x8x8xf32>, vector<4x8x8xf32> -> vector<4x8x8xf32>
    "tpu.trace_stop"() : () -> ()
    %c0_6 = arith.constant 0 : index
    %c0_7 = arith.constant 0 : index
    %c0_8 = arith.constant 0 : index
    %16 = vector.load %arg2[%c0_6, %c0_7, %c0_8] : memref<1x1x8xf32, #tpu.memory_space<vmem>>, vector<1x1x8xf32>
    %cst_9 = arith.constant 5.000000e-01 : f32
    %17 = vector.broadcast %cst_9 : f32 to vector<1x1x8xf32>
    %18 = arith.cmpf ogt, %16, %17 : vector<1x1x8xf32>
    %cst_10 = arith.constant -1.000000e+09 : f32
    %19 = vector.shape_cast %18 : vector<1x1x8xi1> to vector<1x1x8xi1>
    %20 = vector.broadcast %19 : vector<1x1x8xi1> to vector<4x8x8xi1>
    %21 = vector.broadcast %cst_10 : f32 to vector<4x8x8xf32>
    %22 = arith.select %20, %21, %15 : vector<4x8x8xi1>, vector<4x8x8xf32>
    %cst_11 = arith.constant dense<0xFF800000> : vector<4x8xf32>
    %23 = vector.multi_reduction <maximumf>, %22, %cst_11 [2] : vector<4x8x8xf32> to vector<4x8xf32>
    %24 = vector.shape_cast %23 : vector<4x8xf32> to vector<4x8x1xf32>
    %25 = vector.broadcast %24 : vector<4x8x1xf32> to vector<4x8x8xf32>
    %26 = arith.subf %22, %25 : vector<4x8x8xf32>
    %27 = math.exp %26 : vector<4x8x8xf32>
    %cst_12 = arith.constant dense<0.000000e+00> : vector<4x8xf32>
    %28 = vector.multi_reduction <add>, %27, %cst_12 [2] : vector<4x8x8xf32> to vector<4x8xf32>
    %29 = vector.shape_cast %28 : vector<4x8xf32> to vector<4x8x1xf32>
    %30 = vector.broadcast %29 : vector<4x8x1xf32> to vector<4x8x8xf32>
    %31 = arith.divf %27, %30 : vector<4x8x8xf32>
    "tpu.trace_start"() <{level = 10 : i32, message = "hqk,hkd->hqd"}> : () -> ()
    %cst_13 = arith.constant dense<0.000000e+00> : vector<4x8x8xf32>
    %32 = tpu.matmul %31, %14, %cst_13 {dimension_numbers = #tpu.dot_dimension_numbers<[2], [1], [1], [2], [0, 0, 0, 1, 1, 2], [0], [0]>} : vector<4x8x8xf32>, vector<4x8x8xf32>, vector<4x8x8xf32> -> vector<4x8x8xf32>
    "tpu.trace_stop"() : () -> ()
    %33 = tpu.transpose %32, [1, 0, 2] : vector<4x8x8xf32> -> vector<8x4x8xf32>
    %34 = vector.shape_cast %33 : vector<8x4x8xf32> to vector<8x32xf32>
    %c0_14 = arith.constant 0 : index
    %c0_15 = arith.constant 0 : index
    %35 = vector.load %arg4[%c0_14, %c0_15] : memref<32x128xf32, #tpu.memory_space<vmem>>, vector<32x128xf32>
    %cst_16 = arith.constant dense<0.000000e+00> : vector<8x128xf32>
    %36 = tpu.matmul %34, %35, %cst_16 {dimension_numbers = #tpu.dot_dimension_numbers<[1], [0], [0], [1], [0, 0, 1, 1], [], []>} : vector<8x32xf32>, vector<32x128xf32>, vector<8x128xf32> -> vector<8x128xf32>
    %c0_17 = arith.constant 0 : index
    %c0_18 = arith.constant 0 : index
    %c0_19 = arith.constant 0 : index
    %37 = vector.load %arg5[%c0_17, %c0_18, %c0_19] : memref<1x8x128xf32, #tpu.memory_space<vmem>>, vector<1x8x128xf32>
    %38 = vector.shape_cast %37 : vector<1x8x128xf32> to vector<8x128xf32>
    %39 = vector.shape_cast %36 : vector<8x128xf32> to vector<1x8x128xf32>
    tpu.vector_store %arg5[%c0_17, %c0_18, %c0_19], %39 {strides = array<i32>} : memref<1x8x128xf32, #tpu.memory_space<vmem>>, vector<1x8x128xf32>,
    return
  }
  func.func @transform_0(%arg0: i32) -> (i32, i32, i32) {
    %c0_i32 = arith.constant 0 : i32
    %c0_i32_0 = arith.constant 0 : i32
    %c0_i32_1 = arith.constant 0 : i32
    return %arg0, %c0_i32, %c0_i32_0 : i32, i32, i32
  }
  func.func @transform_1(%arg0: i32) -> (i32, i32, i32) {
    %c0_i32 = arith.constant 0 : i32
    %c0_i32_0 = arith.constant 0 : i32
    %c0_i32_1 = arith.constant 0 : i32
    return %arg0, %c0_i32, %c0_i32_0 : i32, i32, i32
  }
  func.func @transform_2(%arg0: i32) -> (i32, i32) {
    %c0_i32 = arith.constant 0 : i32
    %c0_i32_0 = arith.constant 0 : i32
    %c0_i32_1 = arith.constant 0 : i32
    return %c0_i32, %c0_i32_0 : i32, i32
  }
  func.func @transform_3(%arg0: i32) -> (i32, i32) {
    %c0_i32 = arith.constant 0 : i32
    %c0_i32_0 = arith.constant 0 : i32
    %c0_i32_1 = arith.constant 0 : i32
    return %c0_i32, %c0_i32_0 : i32, i32
  }
  func.func @transform_4(%arg0: i32) -> (i32, i32, i32) {
    %c0_i32 = arith.constant 0 : i32
    %c0_i32_0 = arith.constant 0 : i32
    %c0_i32_1 = arith.constant 0 : i32
    return %arg0, %c0_i32, %c0_i32_0 : i32, i32, i32
  }
}

</mosaic_0001>

<bundles_post_ra>
// kernel: tpu_custom_call.1
= control target key start
LH: loop header
LB: loop body
LE: loop exit
PB: predicated region body
PF: predicated region fallthrough
CT: control target
= control target key end

     0   :  { %s2064_s0 = inlined_call_operand.hbm [shape: f32[2,8,128], index: 0, kind: input, shape index: {}]   ;;  %s2065_s1 = inlined_call_operand.hbm [shape: f32[2,1,8], index: 1, kind: input, shape index: {}]   ;;  %s2066_s2 = inlined_call_operand.hbm [shape: f32[128,128], index: 2, kind: input, shape index: {}]   ;;  %s2067_s3 = inlined_call_operand.hbm [shape: f32[32,128], index: 3, kind: input, shape index: {}]   ;;  %s2068_s4 = inlined_call_operand.hbm [shape: f32[2,8,128], index: 4, kind: output, shape index: {}]  }
   0x1   :  { %2069 = sst [smem:[#allocation16_spill]] %s2066_s2 }
   0x2   :  { %2070 = sst [smem:[#allocation17_spill]] %s2067_s3 }
   0x3   :  { %9 = vsyncpa [#allocation3], 0 }
   0x4   :  { %11 = vsyncpa [#allocation3 + $0x1], 0 }
   0x5   :  { %12 = vsyncpa [#allocation6], 0 }
   0x6   :  { %14 = vsyncpa [#allocation6 + $0x1], 0 }
   0x7   :  { %15 = vsyncpa [#allocation9], 0 }
   0x8   :  { %16 = vsyncpa [#allocation4], 0 }
   0x9   :  { %18 = vsyncpa [#allocation4 + $0x1], 0  ;;  %s1655_s15 = smov 0   ;;  %s1657_s16 = smov 0  }
   0xa   :  { %s1659_s17 = smov 0   ;;  %s1661_s18 = smov 0  }
   0xb LB: > { %s2071_s2 = sld [smem:[#allocation16_spill]]  ;;  %s1679_s22 = sadd.s32 4294967295, %s1613_s18   ;;  %s1613_s18 = sphi %s1661_s18, %s2083_s18   ;;  %s1609_s17 = sphi %s1659_s17, %s2082_s17   ;;  %s1605_s16 = sphi %s1657_s16, %s2081_s16   ;;  %s1601_s15 = sphi %s1655_s15, %s2080_s15  }
   0xc   : > { %p1276_p0 = scmp.ge.s32.totalorder %s1613_s18, 1  ;;  %p45_p1 = scmp.eq.s32.totalorder %s1679_s22, 0 }
   0xd   : > { %p149_p2 = scmp.lt.s32.totalorder %s1613_s18, 3  ;;  %s1615_s24 = smov [#allocation7]  }
   0xe   : > { %s162_s25 = sshll.u32 %s1615_s24, 4  ;;  %s2073_s3 = sld [smem:[#allocation17_spill]]  ;;  %s163_s25 = int_to_ptr.vmem [resolvable:$true] %s162_s25 }
   0xf   : > { %p1684_p3 = pnand %p1276_p0, %p149_p2  ;;  %s1616_s29 = smov [#allocation8]  }
  0x10   : > { %s176_s30 = sshll.u32 %s1616_s29, 4  ;;  %s1617_s5 = smov 128   ;;  %s177_s30 = int_to_ptr.vmem [resolvable:$true] %s176_s30 }
  0x11   : > { %s160_s21 = sshll.u32 %s2071_s2, 4  ;;  %p1318_p4 = pneg %p1684_p3  ;;  %s161_s21 = int_to_ptr.hbm [resolvable:$true] %s160_s21 }
  0x12   : > { %s1618_s6 = smov 8   ;;  %s1275_s7 = sadd.s32 4294967294, %s1613_s18  }
  0x13   : > { %p1319_p6 = pnand %p1318_p4, %p45_p1  ;;  %s1698_s8 = sadd.s32 1, %s1613_s18  }
  0x14   : > { %s174_s28 = sshll.u32 %s2073_s3, 4  ;;  %s28_s9 = ssub.s32 %s1613_s18, %s1698_s8  ;;  %s175_s28 = int_to_ptr.hbm [resolvable:$true] %s174_s28 }
  0x15   : > { %1321 = dma.hbm_to_vmem [thread:$0]  (!%p1319_p6), %s161_s21, 2048, %s163_s25, [#allocation6], %s1617_s5, %s1617_s5, %s1618_s6  }
  0x16   : > { %1324 = dma.hbm_to_vmem [thread:$0]  (!%p1319_p6), %s175_s28, 512, %s177_s30, [#allocation9], %s1617_s5, %s1617_s5, %s1618_s6  }
  0x17   : > { %s31_s10 = sadd.s32 1, %s1609_s17  ;;  %p29_p7 = scmp.eq.s32.totalorder %s28_s9, 0 }
  0x18   : > { %p38_p8 = scmp.ne.s32.totalorder %s1609_s17, %s1605_s16  ;;  %p39_p9 = scmp.eq.s32.totalorder %s1613_s18, 0 }
  0x19   : > { %p44_p10 = scmp.ne.s32.totalorder %s1605_s16, %s1601_s15  ;;  %p136_p13 = scmp.eq.s32.totalorder %s1679_s22, 1 }
  0x1a   : > { %s1709_s11 = scalar_select %p29_p7, %s1609_s17, %s31_s10  }
  0x1b   : > { %p1711_p11 = por %p39_p9, %p38_p8  ;;  %p1717_p12 = por %p45_p1, %p44_p10 }
  0x1c   : > { %p142_p0 = scmp.eq.s32.totalorder %s1275_s7, 1  ;;  %p1338_p2 = scmp.lt.s32.totalorder %s1613_s18, 2 }
  0x1d   : > { %s1724_s14 = sand.u32 1, %s1609_s17   ;;  %p1726_p4 = por %p136_p13, %p38_p8 }
  0x1e   : > { %p1730_p6 = por %p142_p0, %p44_p10  ;;  %s1280_s21 = sshll.u32 %s1724_s14, 3 }
  0x1f   : > { %s1281_s24 = sshll.u32 %s1613_s18, 3  ;;  %s194_s28 = scalar_lea.vmem [#allocation2], %s1280_s21 }
  0x20   : > { %s198_s27 = scalar_lea.hbm %s2064_s0, %s1281_s24  ;;  %s202_s29 = sshll.u32 %s194_s28, 4  ;;  %s203_s29 = int_to_ptr.vmem [resolvable:$true] %s202_s29 }
  0x21   : > { %s200_s30 = sshll.u32 %s198_s27, 4  ;;  %p1741_p7 = pnand %p1338_p2, %p1711_p11  ;;  %s201_s30 = int_to_ptr.hbm [resolvable:$true] %s200_s30 }
  0x22   : > { %s209_s6 = sand.u32 1, %s1613_s18   ;;  %s191_s7 = scalar_lea.sflag [#allocation3], %s1724_s14 }
  0x23   : > { %s1475_s9 = sshra.s32 %s201_s30, 4  ;;  %p1479_p9 = pneg %p1741_p7  ;;  %s1476_s9 = int_to_ptr.hbm [resolvable:$true] %s1475_s9 }
  0x24   : > { %s1477_s10 = scalar_lea.hbm %s1476_s9, 8  ;;  %s1482_s24 = scalar_lea.hbm %s2064_s0, 16 }
  0x25   : > { %p1478_p8 = scmp.ne.s32.totalorder %s1476_s9, %s1477_s10  ;;  %p1483_p11 = scmp.lt.s32.totalorder %s1476_s9, %s2064_s0 }
  0x26   : > { %p1484_p0 = scmp.lt.s32.totalorder %s1482_s24, %s1477_s10 }
  0x27   : > { %p1480_p10 = pnand %p1479_p9, %p1478_p8 }
  0x28   : > { %p1485_p2 = por %p1484_p0, %p1483_p11 }
  0x29   : > { %p1481_p13 = pneg %p1480_p10 }
  0x2b   : > { %p1486_p5 = pnand %p1485_p2, %p1481_p13 }
  0x2d   : > { %1489 = shalt.err (!%p1486_p5)
}
  0x2e   : > { %1328 = dma.hbm_to_vmem [thread:$0]  (!%p1741_p7), %s201_s30, 128, %s203_s29, %s191_s7  }
  0x2f   : > { %s215_s2 = scalar_lea.hbm %s2065_s1, %s1613_s18  ;;  %s212_s21 = scalar_lea.vmem [#allocation5], %s1724_s14 }
  0x30   : > { %s219_s12 = sshll.u32 %s212_s21, 4  ;;  %s217_s3 = sshll.u32 %s215_s2, 4  ;;  %s220_s12 = int_to_ptr.vmem [resolvable:$true] %s219_s12  ;;  %s218_s3 = int_to_ptr.hbm [resolvable:$true] %s217_s3 }
  0x31   : > { %s210_s9 = scalar_lea.sflag [#allocation6], %s209_s6  ;;  %s1505_s10 = sshra.s32 %s218_s3, 4  ;;  %s1506_s10 = int_to_ptr.hbm [resolvable:$true] %s1505_s10 }
  0x32   : > { %s1507_s24 = scalar_lea.hbm %s1506_s10, 1  ;;  %s1512_s30 = scalar_lea.hbm %s2065_s1, 2 }
  0x33   : > { %p1508_p5 = scmp.ne.s32.totalorder %s1506_s10, %s1507_s24  ;;  %p1513_p13 = scmp.lt.s32.totalorder %s1506_s10, %s2065_s1 }
  0x34   : > { %p1514_p11 = scmp.lt.s32.totalorder %s1512_s30, %s1507_s24 }
  0x35   : > { %p1510_p8 = pnand %p1508_p5, %p1479_p9 }
  0x36   : > { %p1515_p0 = por %p1514_p11, %p1513_p13 }
  0x37   : > { %p1511_p10 = pneg %p1510_p8 }
  0x39   : > { %p1516_p2 = pnand %p1515_p0, %p1511_p10 }
  0x3b   : > { %1519 = shalt.err (!%p1516_p2)
}
  0x3c   : > { %1331 = dma.hbm_to_vmem [thread:$0]  (!%p1741_p7), %s218_s3, 16, %s220_s12, %s210_s9  }
  0x3d   : > { %228 = sbr.rel (%p1684_p3) target bundleno = 1309 (0x51d), region = 36  ;;  %s1779_s2 = sand.u32 (!%p1684_p3), 1, %s1605_s16  }
  0x3e   : > { %s1283_s14 = sshll.u32 (!%p1684_p3), %s1779_s2, 3  ;;  %s231_s6 = scalar_lea.sflag (!%p1684_p3), [#allocation3], %s1779_s2 }
  0x3f   : > { %s1785_s27 = scalar_lea.vmem (!%p1684_p3), [#allocation2], %s1283_s14 }
  0x42   : > { %1580 = dma.done.wait (%p1717_p12), %s231_s6, 128  }
  0x43   : > { %1582 = vsyncadd (%p1717_p12), %s231_s6, 4294967168  ;;  %s240_s3 = sand.u32 1, %s1679_s22   ;;  %s243_s5 = scalar_lea.vmem [#allocation5], %s1779_s2 }
  0x44   : > { %s241_s23 = scalar_lea.sflag [#allocation6], %s240_s3 }
  0x45   : > { %1584 = dma.done.wait (%p1717_p12), %s241_s23, 16  }
  0x46   : > { %1586 = vsyncadd (%p1717_p12), %s241_s23, 4294967280 }
  0x47   : > { %1588 = dma.done.wait (%p45_p1), [#allocation6], 2048  }
  0x48   : > { %1590 = vsyncadd (%p45_p1), [#allocation6], 4294965248 }
  0x49   : > { %1592 = dma.done.wait (%p45_p1), [#allocation9], 512  }
  0x4a   : > { %1594 = vsyncadd (%p45_p1), [#allocation9], 4294966784  ;;  %v299_v0 = vld [vmem:[#allocation7 + $0x78] sm:$0xff]  ;;  %v298_v1 = vld [vmem:[#allocation7 + $0x70] sm:$0xff]  ;;  %s1619_s13 = smov 104   ;;  %s1620_s28 = smov 120  }
  0x4b   : > { %300 = vmatpush.msra.mxu0 %v299_v0  ;;  %v297_v2 = vld [vmem:[#allocation7 + $0x68] sm:$0xff]  ;;  %v296_v3 = vld [vmem:[#allocation7 + $0x60] sm:$0xff]  ;;  %v295_v4 = vld [vmem:[#allocation7 + $0x58] sm:$0xff]  ;;  %s1621_s21 = smov 96   ;;  %s1622_s12 = smov 112   ;;  %vm332_vm0 = vcmask 1047556  }
  0x4c   : > { %v294_v5 = vld [vmem:[#allocation7 + $0x50] sm:$0xff]  ;;  %v293_v6 = vld [vmem:[#allocation7 + $0x48] sm:$0xff]  ;;  %v292_v7 = vld [vmem:[#allocation7 + $0x40] sm:$0xff]  ;;  %v1623_v25 = vmov 1983009808   ;;  %vm693_vm1 = vcmask 64512  }
  0x4d   : > { %301 = vmatpush.msra.mxu0 %v298_v1  ;;  %v291_v8 = vld [vmem:[#allocation7 + $0x38] sm:$0xff]  ;;  %v290_v9 = vld [vmem:[#allocation7 + $0x30] sm:$0xff]  ;;  %v289_v10 = vld [vmem:[#allocation7 + $0x28] sm:$0xff]  ;;  %v337_v26 = vunpack.c.l.s4 %v1623_v25  ;;  %v1624_v34 = vmov 1934713408   ;;  %s1626_s9 = smov 64  }
  0x4e   : > { %v288_v11 = vld [vmem:[#allocation7 + $0x20] sm:$0xff]  ;;  %v287_v12 = vld [vmem:[#allocation7 + $0x18] sm:$0xff]  ;;  %v286_v13 = vld [vmem:[#allocation7 + $0x10] sm:$0xff]  ;;  %v361_v35 = vunpack.c.l.s4 %v1624_v34  ;;  %s1627_s10 = smov 16   ;;  %s1628_s24 = smov 8  }
  0x4f   : > { %302 = vmatpush.msra.mxu0 %v297_v2  ;;  %v285_v14 = vld [vmem:[#allocation7 + $0x8] sm:$0xff]  ;;  %v284_v15 = vld [vmem:[#allocation7] sm:$0xff]  ;;  %v1822_v29 = vunpack.c.0.s8 %v337_v26  ;;  %s1629_s25 = smov 24   ;;  %s1301_s29 = sshll.u32 %s1679_s22, 3 }
  0x50   : > { %v283_v16 = vld [vmem:[%s1785_s27] sm:$0xff]  ;;  %v1830_v43 = vunpack.c.0.s8 %v361_v35  ;;  %s1162_s26 = scalar_lea.hbm %s2068_s4, %s1301_s29  ;;  %s282_s6 = scalar_lea.vmem [#allocation10], %s1283_s14 }
  0x51   : > { %303 = vmatpush.msra.mxu0 %v296_v3  ;;  %s1164_s27 = sshll.u32 %s282_s6, 4  ;;  %s1166_s3 = sshll.u32 %s1162_s26, 4  ;;  %s1165_s27 = int_to_ptr.vmem [resolvable:$true] %s1164_s27  ;;  %s1167_s3 = int_to_ptr.hbm [resolvable:$true] %s1166_s3 }
  0x52   : > { %s1152_s23 = scalar_lea.sflag [#allocation4], %s1779_s2 }
  0x53   : > { %304 = vmatpush.msra.mxu0 %v295_v4 }
  0x55   : > { %305 = vmatpush.msra.mxu0 %v294_v5 }
  0x57   : > { %306 = vmatpush.msra.mxu0 %v293_v6 }
  0x59   : > { %307 = vmatpush.msra.mxu0 %v292_v7 }
  0x5b   : > { %308 = vmatpush.msra.mxu0 %v291_v8 }
  0x5d   : > { %309 = vmatpush.msra.mxu0 %v290_v9 }
  0x5f   : > { %310 = vmatpush.msra.mxu0 %v289_v10 }
  0x61   : > { %311 = vmatpush.msra.mxu0 %v288_v11 }
  0x63   : > { %312 = vmatpush.msra.mxu0 %v287_v12 }
  0x65   : > { %313 = vmatpush.msra.mxu0 %v286_v13 }
  0x67   : > { %314 = vmatpush.msra.mxu0 %v285_v14 }
  0x69   : > { %315 = vmatpush.msra.mxu0 %v284_v15 }
  0x6a   : > { %316 = vmatmul.f32.vlgmr.msra.gmra.mxu0 %v283_v16 }
  0xe7   : > { %v1806_v17 = vpop.f32.mrf.mxu0 }
  0xe8   : > { %447 = vrot.lane.b32.xlu1 %v1806_v17, %s1619_s13  ;;  %443 = vrot.lane.b32.xlu0 %v1806_v17, %s1620_s28  ;;  %v320_v18 = vmul.f32 0.35355338, %v1806_v17 }
  0xea   : > { %v334_v37 = vrot.slane %v320_v18, 4 }
  0xf0   : > { %449 = vrot.lane.b32.xlu1 %v1806_v17, %s1621_s21  ;;  %445 = vrot.lane.b32.xlu0 %v1806_v17, %s1622_s12 }
  0xf8   : > { %322 = vrot.lane.b32.xlu1 %v320_v18, %s1620_s28 }
 0x15a   : > { %v1813_v19 = vpop.permute.xlu1 %447  ;;  %v1815_v20 = vpop.permute.xlu0 %443 }
 0x15b   : > { %455 = vrot.lane.b32.xlu0 %v1813_v19, %s1621_s21  ;;  %451 = vrot.lane.b32.xlu2 %v1815_v20, %s1621_s21 }
 0x162   : > { %v1819_v21 = vpop.permute.xlu0 %445  ;;  %v450_v24 = vpop.permute.xlu1 %449 }
 0x163   : > { %453 = vrot.lane.b32.xlu2 %v1819_v21, %s1621_s21  ;;  %328 = vrot.lane.b32.xlu0 %v320_v18, %s1619_s13  ;;  %v463_v28 = vrot.slane %v450_v24, 4  ;;  %s1555_s21 = scalar_lea.hbm %s2068_s4, 16 }
 0x16a   : > { %v323_v55 = vpop.permute.xlu1 %322 }
 0x16b   : > { %325 = vrot.lane.b32.xlu2 %v320_v18, %s1622_s12  ;;  %v346_v63 = vrot.slane %v323_v55, 4 }
 0x1b5   : > { %v452_v22 = vpop.permute.xlu2 %451 }
 0x1b6   : > { %v475_v38 = vrot.slane %v452_v22, 4 }
 0x1bd   : > { %v454_v23 = vpop.permute.xlu2 %453 }
 0x1be   : > { %v461_v27 = vrot.slane %v454_v23, 4  ;;  %v464_v31 = vsel %vm332_vm0, %v454_v23, %v463_v28 }
 0x1bf   : > { %v472_v36 = vperm.slane %v464_v31, %v1822_v29 }
 0x1c0   : > { %v462_v32 = vsel %vm332_vm0, %v461_v27, %v450_v24 }
 0x1c1   : > { %v468_v39 = vperm.slane %v462_v32, %v1822_v29  ;;  %v499_v46 = vrot.slane %v472_v36, 4 }
 0x1c3   : > { %v487_v48 = vrot.slane %v468_v39, 4 }
 0x1c5   : > { %v326_v30 = vpop.permute.xlu2 %325 }
 0x1c6   : > { %v331_v33 = vrot.slane %v326_v30, 4  ;;  %v335_v40 = vsel %vm332_vm0, %v326_v30, %v334_v37 }
 0x1c7   : > { %v343_v49 = vperm.slane %v335_v40, %v1822_v29 }
 0x1c8   : > { %v333_v42 = vsel %vm332_vm0, %v331_v33, %v320_v18 }
 0x1c9   : > { %v339_v51 = vperm.slane %v333_v42, %v1822_v29  ;;  %v370_v1 = vrot.slane %v343_v49, 4 }
 0x1cb   : > { %v358_v0 = vrot.slane %v339_v51, 4 }
 0x1cd   : > { %v456_v41 = vpop.permute.xlu0 %455 }
 0x1ce   : > { %v473_v44 = vrot.slane %v456_v41, 4  ;;  %v476_v45 = vsel %vm332_vm0, %v456_v41, %v475_v38 }
 0x1cf   : > { %v484_v47 = vperm.slane %v476_v45, %v1822_v29 }
 0x1d0   : > { %v474_v50 = vsel %vm332_vm0, %v473_v44, %v452_v22 }
 0x1d1   : > { %v480_v52 = vperm.slane %v474_v50, %v1822_v29  ;;  %v497_v53 = vrot.slane %v484_v47, 4  ;;  %v500_v54 = vsel %vm332_vm0, %v484_v47, %v499_v46 }
 0x1d2   : > { %v508_v56 = vperm.slane %v500_v54, %v1830_v43 }
 0x1d3   : > { %v485_v57 = vrot.slane %v480_v52, 4  ;;  %v488_v58 = vsel %vm332_vm0, %v480_v52, %v487_v48  ;;  %v498_v59 = vsel %vm332_vm0, %v497_v53, %v472_v36 }
 0x1d4   : > { %v496_v60 = vperm.slane %v488_v58, %v1830_v43  ;;  %v504_v61 = vperm.slane %v498_v59, %v1830_v43  ;;  %v515_v62 = vrot.slane %v508_v56, 4 }
 0x1d5   : > { %v486_v2 = vsel %vm332_vm0, %v485_v57, %v468_v39  ;;  %v329_v3 = vpop.permute.xlu0 %328 }
 0x1d6   : > { %v492_v4 = vperm.slane %v486_v2, %v1830_v43  ;;  %v511_v5 = vrot.slane %v496_v60, 4  ;;  %v513_v6 = vrot.slane %v504_v61, 4  ;;  %v516_v7 = vsel %vm332_vm0, 0.0, %v515_v62 }
 0x1d7   : > { %v528_v8 = vsel %vm332_vm0, %v515_v62, %v504_v61  ;;  %v533_v9 = vrot.slane %v516_v7, 4  ;;  %v344_v10 = vrot.slane %v329_v3, 4  ;;  %v347_v11 = vsel %vm332_vm0, %v329_v3, %v346_v63 }
 0x1d8   : > { %v512_v12 = vsel %vm332_vm0, 0.0, %v511_v5  ;;  %v514_v13 = vsel %vm332_vm0, 0.0, %v513_v6  ;;  %v532_v14 = vperm.slane %v528_v8, %v1822_v29  ;;  %v355_v15 = vperm.slane %v347_v11, %v1822_v29 }
 0x1d9   : > { %v522_v16 = vrot.slane %v512_v12, 4  ;;  %v345_v18 = vsel %vm332_vm0, %v344_v10, %v323_v55  ;;  %v509_v22 = vrot.slane %v492_v4, 4  ;;  %v517_v23 = vsel %vm332_vm0, %v511_v5, %v492_v4 }
 0x1da   : > { %v351_v24 = vperm.slane %v345_v18, %v1822_v29  ;;  %v368_v25 = vrot.slane %v355_v15, 4  ;;  %v371_v26 = vsel %vm332_vm0, %v355_v15, %v370_v1  ;;  %v521_v27 = vperm.slane %v517_v23, %v1822_v29 }
 0x1db   : > { %v379_v28 = vperm.slane %v371_v26, %v1830_v43  ;;  %v510_v30 = vsel %vm332_vm0, 0.0, %v509_v22  ;;  %v534_v31 = vsel %vm332_vm0, %v533_v9, %v514_v13  ;;  %v553_v32 = vrot.slane %v532_v14, 4 }
 0x1dc   : > { %v356_v33 = vrot.slane %v351_v24, 4  ;;  %v359_v34 = vsel %vm332_vm0, %v351_v24, %v358_v0  ;;  %v369_v35 = vsel %vm332_vm0, %v368_v25, %v343_v49  ;;  %v523_v36 = vsel %vm332_vm0, %v522_v16, %v510_v30 }
 0x1dd   : > { %v367_v37 = vperm.slane %v359_v34, %v1830_v43  ;;  %v375_v38 = vperm.slane %v369_v35, %v1830_v43  ;;  %v386_v39 = vrot.slane %v379_v28, 4  ;;  %v527_v40 = vperm.slane %v523_v36, %v1822_v29 }
 0x1de   : > { %v357_v41 = vsel %vm332_vm0, %v356_v33, %v339_v51  ;;  %v538_v42 = vperm.slane %v534_v31, %v1822_v29  ;;  %v541_v44 = vrot.slane %v521_v27, 4 }
 0x1df   : > { %v363_v45 = vperm.slane %v357_v41, %v1830_v43  ;;  %v382_v46 = vrot.slane %v367_v37, 4  ;;  %v384_v47 = vrot.slane %v375_v38, 4  ;;  %v387_v48 = vsel %vm332_vm0, 0.0, %v386_v39 }
 0x1e0   : > { %v399_v49 = vsel %vm332_vm0, %v386_v39, %v375_v38  ;;  %v404_v50 = vrot.slane %v387_v48, 4  ;;  %v542_v52 = vsel %vm332_vm0, %v527_v40, %v541_v44  ;;  %v554_v53 = vsel %vm332_vm0, %v538_v42, %v553_v32 }
 0x1e1   : > { %v380_v54 = vrot.slane %v363_v45, 4  ;;  %v383_v51 = vsel %vm332_vm0, 0.0, %v382_v46  ;;  %v385_v55 = vsel %vm332_vm0, 0.0, %v384_v47  ;;  %v403_v56 = vperm.slane %v399_v49, %v1822_v29 }
 0x1e2   : > { %v393_v57 = vrot.slane %v383_v51, 4  ;;  %v550_v58 = vperm.slane %v542_v52, %v1830_v43  ;;  %v562_v59 = vperm.slane %v554_v53, %v1830_v43  ;;  %v539_v60 = vrot.slane %v527_v40, 4 }
 0x1e3   : > { %v551_v61 = vrot.slane %v538_v42, 4  ;;  %v381_v62 = vsel %vm332_vm0, 0.0, %v380_v54  ;;  %v388_v63 = vsel %vm332_vm0, %v382_v46, %v363_v45  ;;  %v405_v0 = vsel %vm332_vm0, %v404_v50, %v385_v55  ;;  %v798_v42 = vld [vmem:[%s243_s5] sm:$0x1]  ;;  %s1549_s5 = sshra.s32 %s1167_s3, 4  ;;  %s1550_s5 = int_to_ptr.hbm [resolvable:$true] %s1549_s5 }
 0x1e4   : > { %v567_v1 = vrot.slane %v562_v59, 4  ;;  %v540_v2 = vsel %vm332_vm0, %v539_v60, %v521_v27  ;;  %v569_v3 = vrot.slane %v550_v58, 4  ;;  %v392_v4 = vperm.slane %v388_v63, %v1822_v29  ;;  %s1551_s13 = scalar_lea.hbm %s1550_s5, 8  ;;  %p1556_p7 = scmp.lt.s32.totalorder %s1550_s5, %s2068_s4 }
 0x1e5   : > { %v546_v5 = vperm.slane %v540_v2, %v1830_v43  ;;  %v552_v6 = vsel %vm332_vm0, %v551_v61, %v532_v14  ;;  %v394_v7 = vsel %vm332_vm0, %v393_v57, %v381_v62  ;;  %v409_v8 = vperm.slane %v405_v0, %v1822_v29  ;;  %p1552_p1 = scmp.ne.s32.totalorder %s1550_s5, %s1551_s13  ;;  %p1557_p9 = scmp.lt.s32.totalorder %s1555_s21, %s1551_s13 }
 0x1e6   : > { %v568_v9 = vsel %vm332_vm0, %v567_v1, %v550_v58  ;;  %v558_v10 = vperm.slane %v552_v6, %v1830_v43  ;;  %v398_v11 = vperm.slane %v394_v7, %v1822_v29  ;;  %v412_v13 = vrot.slane %v392_v4, 4 }
 0x1e7   : > { %1291 = vmatpush.xpose.msk.msra.mxu3 %vm693_vm1, %v568_v9  ;;  %v565_v12 = vrot.slane %v546_v5, 4  ;;  %v424_v15 = vrot.slane %v403_v56, 4  ;;  %v422_v16 = vrot.slane %v409_v8, 4  ;;  %v570_v22 = vsel %vm332_vm0, %v562_v59, %v569_v3  ;;  %p1553_p3 = pnand %p1552_p1, %p1726_p4  ;;  %p1558_p5 = por %p1557_p9, %p1556_p7 }
 0x1e8   : > { %v563_v18 = vrot.slane %v558_v10, 4  ;;  %v410_v14 = vrot.slane %v398_v11, 4  ;;  %v413_v24 = vsel %vm332_vm0, %v398_v11, %v412_v13  ;;  %vm799_vm2 = vcmp.gt.f32.partialorder %v798_v42, 0.5 }
 0x1e9   : > { %v566_v23 = vsel %vm332_vm0, %v558_v10, %v565_v12  ;;  %v425_v25 = vsel %vm332_vm0, %v409_v8, %v424_v15  ;;  %v423_v26 = vsel %vm332_vm0, %v422_v16, %v403_v56  ;;  %v421_v28 = vperm.slane %v413_v24, %v1830_v43  ;;  %p1554_p12 = pneg %p1553_p3 }
 0x1ea   : > { %v564_v27 = vsel %vm332_vm0, %v563_v18, %v546_v5  ;;  %1289 = vmatpush.xpose.msk.msra.mxu2 %vm693_vm1, %v566_v23  ;;  %v433_v30 = vperm.slane %v425_v25, %v1830_v43  ;;  %v411_v31 = vsel %vm332_vm0, %v410_v14, %v392_v4  ;;  %v429_v33 = vperm.slane %v423_v26, %v1830_v43 }
 0x1eb   : > { %1287 = vmatpush.xpose.msk.msra.mxu1 %vm693_vm1, %v564_v27  ;;  %v417_v32 = vperm.slane %v411_v31, %v1830_v43  ;;  %v440_v40 = vrot.slane %v421_v28, 4  ;;  %v1625_v44 = vmov 0   ;;  %v1389_v59 = vpack.i.bf16 %v1815_v20, %v1806_v17  ;;  %p1559_p8 = pnand %p1558_p5, %p1554_p12 }
 0x1ec   : > { %v438_v34 = vrot.slane %v433_v30, 4  ;;  %v434_v35 = vrot.slane %v429_v33, 4  ;;  %v800_v45 = vsel %vm799_vm2, 1, %v1625_v44  ;;  %v1394_v60 = vpack.i.bf16 %v1813_v19, %v1819_v21 }
 0x1ed   : > { %v436_v36 = vrot.slane %v417_v32, 4  ;;  %v441_v41 = vsel %vm332_vm0, %v433_v30, %v440_v40  ;;  %v801_v46 = vperm.slane %v800_v45, 0 }
 0x1ee   : > { %v439_v37 = vsel %vm332_vm0, %v438_v34, %v421_v28  ;;  %v435_v38 = vsel %vm332_vm0, %v434_v35, %v417_v32 }
 0x1ef   : > { %1293 = vmatpush.xpose.msk.msrb.mxu1 %vm693_vm1, %v570_v22  ;;  %1292 = vmatmul.msk.f32.vlgmr.msra.gmra.mxu3 %vm693_vm1, %v439_v37  ;;  %v437_v39 = vsel %vm332_vm0, %v429_v33, %v436_v36  ;;  %vm802_vm3 = vcmp.eq.s32.totalorder %v801_v46, 1 }
 0x1f0   : > { %1288 = vmatmul.msk.f32.vlgmr.msra.gmra.mxu1 %vm693_vm1, %v435_v38  ;;  %1290 = vmatmul.msk.f32.vlgmr.msra.gmra.mxu2 %vm693_vm1, %v437_v39 }
 0x1f8   : > { %1294 = vmatmul.msk.f32.vlgmr.msrb.gmra.mxu1 %vm693_vm1, %v441_v41 }
 0x26d   : > { %v717_v47 = vpop.f32.mrf.mxu1 }
 0x26e   : > { %v803_v48 = vsel %vm802_vm3, -1e+09, %v717_v47 }
 0x26f   : > { %v807_v49 = vsel %vm693_vm1, %v803_v48, -inf }
 0x270   : > { %808 = vmax.xlane.f32.xlu1 %v807_v49 }
 0x272   : > { %v769_v56 = vpop.f32.mrf.mxu3 }
 0x273   : > { %v743_v50 = vpop.f32.mrf.mxu2  ;;  %v805_v57 = vsel %vm802_vm3, -1e+09, %v769_v56 }
 0x274   : > { %v804_v52 = vsel %vm802_vm3, -1e+09, %v743_v50  ;;  %v813_v58 = vsel %vm693_vm1, %v805_v57, -inf }
 0x275   : > { %v795_v53 = vpop.f32.mrf.mxu1  ;;  %v810_v54 = vsel %vm693_vm1, %v804_v52, -inf }
 0x276   : > { %v806_v51 = vsel %vm802_vm3, -1e+09, %v795_v53  ;;  %811 = vmax.xlane.f32.xlu0 %v810_v54 }
 0x277   : > { %v816_v55 = vsel %vm693_vm1, %v806_v51, -inf }
 0x278   : > { %817 = vmax.xlane.f32.xlu2 %v816_v55 }
 0x280   : > { %814 = vmax.xlane.f32.xlu2 %v813_v58 }
 0x289   : > { %1390 = vrot.lane.b32.xlu1 %v1389_v59, %s1626_s9 }
 0x298   : > { %1395 = vrot.lane.b32.xlu2 %v1394_v60, %s1626_s9 }
 0x2e3   : > { %v809_v61 = vpop.xlane.xlu1 %808 }
 0x2e4   : > { %v819_v62 = vsub.f32 %v803_v48, %v809_v61 }
 0x2e6   : > { %v823_v63 = vmul.f32 1.442695, %v819_v62 }
 0x2e8   : > { %1399 = vpow2.f32 %v823_v63 }
 0x2e9   : > { %v812_v0 = vpop.xlane.xlu0 %811 }
 0x2ea   : > { %v820_v4 = vsub.f32 %v804_v52, %v812_v0 }
 0x2eb   : > { %v818_v1 = vpop.xlane.xlu2 %817 }
 0x2ec   : > { %v822_v2 = vsub.f32 %v806_v51, %v818_v1  ;;  %v825_v20 = vmul.f32 1.442695, %v820_v4 }
 0x2ee   : > { %v1924_v3 = vpop.eup %1399  ;;  %v829_v5 = vmul.f32 1.442695, %v822_v2 }
 0x2ef   : > { %v831_v17 = vsel %vm693_vm1, %v1924_v3, 0.0 }
 0x2f0   : > { %1401 = vpow2.f32 %v829_v5  ;;  %832 = vadd.xlane.f32.xlu0 %v831_v17 }
 0x2f1   : > { %1403 = vpow2.f32 %v825_v20 }
 0x2f3   : > { %v815_v6 = vpop.xlane.xlu2 %814 }
 0x2f4   : > { %v821_v19 = vsub.f32 %v805_v57, %v815_v6 }
 0x2f6   : > { %v1928_v21 = vpop.eup %1401  ;;  %v827_v7 = vmul.f32 1.442695, %v821_v19 }
 0x2f7   : > { %v840_v8 = vsel %vm693_vm1, %v1928_v21, 0.0  ;;  %v1932_v11 = vpop.eup %1403 }
 0x2f8   : > { %1405 = vpow2.f32 %v827_v7  ;;  %841 = vadd.xlane.f32.xlu0 %v840_v8  ;;  %v834_v25 = vsel %vm693_vm1, %v1932_v11, 0.0 }
 0x2fb   : > { %v1391_v9 = vpop.permute.xlu1 %1390  ;;  %v1396_v10 = vpop.permute.xlu2 %1395 }
 0x2fc   : > { %v1393_v12 = vunpack.i.h.bf16 %v1391_v9  ;;  %v1392_v13 = vunpack.i.l.bf16 %v1391_v9  ;;  %v1398_v15 = vunpack.i.h.bf16 %v1396_v10  ;;  %v1397_v16 = vunpack.i.l.bf16 %v1396_v10 }
 0x2fe   : > { %v1934_v18 = vpop.eup %1405  ;;  %v597_v22 = vrot.slane %v1393_v12, 4  ;;  %v585_v14 = vrot.slane %v1392_v13, 4  ;;  %v595_v23 = vrot.slane %v1398_v15, 4  ;;  %v583_v24 = vrot.slane %v1397_v16, 4 }
 0x2ff   : > { %v837_v26 = vsel %vm693_vm1, %v1934_v18, 0.0 }
 0x300   : > { %v596_v27 = vsel %vm332_vm0, %v595_v23, %v1393_v12  ;;  %v598_v28 = vsel %vm332_vm0, %v1398_v15, %v597_v22  ;;  %v584_v30 = vsel %vm332_vm0, %v583_v24, %v1392_v13  ;;  %v586_v31 = vsel %vm332_vm0, %v1397_v16, %v585_v14  ;;  %835 = vadd.xlane.f32.xlu0 %v834_v25 }
 0x301   : > { %v602_v32 = vperm.slane %v596_v27, %v1822_v29  ;;  %v606_v33 = vperm.slane %v598_v28, %v1822_v29  ;;  %v590_v34 = vperm.slane %v584_v30, %v1822_v29  ;;  %v594_v35 = vperm.slane %v586_v31, %v1822_v29  ;;  %838 = vadd.xlane.f32.xlu1 %v837_v26 }
 0x303   : > { %v607_v36 = vrot.slane %v602_v32, 4  ;;  %v619_v37 = vrot.slane %v606_v33, 4  ;;  %v609_v38 = vrot.slane %v590_v34, 4  ;;  %v621_v39 = vrot.slane %v594_v35, 4 }
 0x305   : > { %v608_v40 = vsel %vm332_vm0, %v607_v36, %v590_v34  ;;  %v610_v41 = vsel %vm332_vm0, %v602_v32, %v609_v38  ;;  %v620_v42 = vsel %vm332_vm0, %v619_v37, %v594_v35  ;;  %v622_v44 = vsel %vm332_vm0, %v606_v33, %v621_v39 }
 0x306   : > { %v614_v45 = vperm.slane %v608_v40, %v1830_v43  ;;  %v618_v46 = vperm.slane %v610_v41, %v1830_v43  ;;  %v626_v47 = vperm.slane %v620_v42, %v1830_v43  ;;  %v630_v48 = vperm.slane %v622_v44, %v1830_v43 }
 0x308   : > { %v631_v49 = vrot.slane %v614_v45, 4  ;;  %v633_v50 = vrot.slane %v618_v46, 4  ;;  %v635_v52 = vrot.slane %v626_v47, 4  ;;  %v637_v53 = vrot.slane %v630_v48, 4 }
 0x30a   : > { %v634_v54 = vsel %vm332_vm0, 0.0, %v633_v50  ;;  %v638_v51 = vsel %vm332_vm0, 0.0, %v637_v53  ;;  %v650_v55 = vsel %vm332_vm0, %v637_v53, %v626_v47  ;;  %v639_v58 = vsel %vm332_vm0, %v633_v50, %v614_v45 }
 0x30b   : > { %v644_v56 = vrot.slane %v634_v54, 4  ;;  %v655_v57 = vrot.slane %v638_v51, 4  ;;  %v636_v59 = vsel %vm332_vm0, 0.0, %v635_v52  ;;  %v632_v60 = vsel %vm332_vm0, 0.0, %v631_v49 }
 0x30c   : > { %v643_v61 = vperm.slane %v639_v58, %v1822_v29  ;;  %v654_v62 = vperm.slane %v650_v55, %v1822_v29 }
 0x30d   : > { %v645_v63 = vsel %vm332_vm0, %v644_v56, %v632_v60  ;;  %v656_v0 = vsel %vm332_vm0, %v655_v57, %v636_v59 }
 0x30e   : > { %v649_v1 = vperm.slane %v645_v63, %v1822_v29  ;;  %v660_v2 = vperm.slane %v656_v0, %v1822_v29  ;;  %v663_v4 = vrot.slane %v643_v61, 4  ;;  %v675_v5 = vrot.slane %v654_v62, 4 }
 0x310   : > { %v664_v17 = vsel %vm332_vm0, %v649_v1, %v663_v4  ;;  %v676_v20 = vsel %vm332_vm0, %v660_v2, %v675_v5  ;;  %v661_v6 = vrot.slane %v649_v1, 4  ;;  %v673_v19 = vrot.slane %v660_v2, 4 }
 0x311   : > { %v672_v7 = vperm.slane %v664_v17, %v1830_v43  ;;  %v684_v8 = vperm.slane %v676_v20, %v1830_v43 }
 0x312   : > { %v662_v9 = vsel %vm332_vm0, %v661_v6, %v643_v61  ;;  %v674_v10 = vsel %vm332_vm0, %v673_v19, %v654_v62 }
 0x313   : > { %v689_v12 = vrot.slane %v684_v8, 4  ;;  %v668_v13 = vperm.slane %v662_v9, %v1830_v43  ;;  %v680_v15 = vperm.slane %v674_v10, %v1830_v43  ;;  %v691_v16 = vrot.slane %v672_v7, 4 }
 0x315   : > { %v690_v22 = vsel %vm332_vm0, %v689_v12, %v672_v7  ;;  %v685_v14 = vrot.slane %v680_v15, 4  ;;  %v687_v23 = vrot.slane %v668_v13, 4  ;;  %v692_v26 = vsel %vm332_vm0, %v684_v8, %v691_v16 }
 0x316   : > { %967 = vmatpush.msra.mxu1 %v690_v22 }
 0x317   : > { %v686_v24 = vsel %vm332_vm0, %v685_v14, %v668_v13  ;;  %v688_v25 = vsel %vm332_vm0, %v680_v15, %v687_v23 }
 0x318   : > { %921 = vmatpush.msrb.mxu2 %v686_v24  ;;  %944 = vmatpush.msrb.mxu3 %v688_v25 }
 0x31a   : > { %990 = vmatpush.msra.mxu2 %v692_v26 }
 0x363   : > { %v833_v27 = vpop.xlane.xlu0 %832 }
 0x364   : > { %1407 = vrcp.f32 %v833_v27  ;;  %v854_v34 = vand.u32 2147483648, %v833_v27  ;;  %vm848_vm5 = vweird.f32 %v833_v27  ;;  %v852_v36 = vand.u32 2147483647, %v833_v27 }
 0x366   : > { %v855_v41 = vor.u32 1.1754944e-38, %v854_v34  ;;  %vm853_vm7 = vcmp.eq.f32.partialorder %v852_v36, 8.507059e+37 }
 0x36a   : > { %v1408_v28 = vpop.eup %1407 }
 0x36b   : > { %v844_v30 = vmul.f32 %v1408_v28, %v833_v27  ;;  %v842_v31 = vpop.xlane.xlu0 %841  ;;  %vm849_vm4 = vweird.f32 %v1408_v28 }
 0x36c   : > { %1409 = vrcp.f32 %v842_v31  ;;  %vm850_vm6 = vmor %vm848_vm5, %vm849_vm4  ;;  %v899_v45 = vand.u32 2147483648, %v842_v31  ;;  %v897_v48 = vand.u32 2147483647, %v842_v31  ;;  %vm893_vm9 = vweird.f32 %v842_v31 }
 0x36d   : > { %v845_v32 = vsub.f32 1.0, %v844_v30 }
 0x36e   : > { %v900_v53 = vor.u32 1.1754944e-38, %v899_v45  ;;  %vm898_vm11 = vcmp.eq.f32.partialorder %v897_v48, 8.507059e+37 }
 0x36f   : > { %v846_v33 = vmul.f32 %v1408_v28, %v845_v32 }
 0x371   : > { %v847_v35 = vadd.f32 %v1408_v28, %v846_v33 }
 0x372   : > { %v1410_v37 = vpop.eup %1409 }
 0x373   : > { %v889_v38 = vmul.f32 %v1410_v37, %v842_v31  ;;  %v836_v39 = vpop.xlane.xlu0 %835  ;;  %v851_v40 = vsel %vm850_vm6, %v1408_v28, %v847_v35  ;;  %vm894_vm8 = vweird.f32 %v1410_v37  ;;  %vm1118_vm6 = vcmask 130048  }
 0x374   : > { %1411 = vrcp.f32 %v836_v39  ;;  %v839_v42 = vpop.xlane.xlu1 %838  ;;  %v856_v46 = vsel %vm853_vm7, %v855_v41, %v851_v40  ;;  %vm895_vm10 = vmor %vm893_vm9, %vm894_vm8  ;;  %v869_v60 = vand.u32 2147483648, %v836_v39  ;;  %vm863_vm14 = vweird.f32 %v836_v39 }
 0x375   : > { %v890_v44 = vsub.f32 1.0, %v889_v38  ;;  %1413 = vrcp.f32 %v839_v42  ;;  %v857_v49 = vmul.f32 %v1924_v3, %v856_v46  ;;  %v867_v3 = vand.u32 2147483647, %v836_v39 }
 0x376   : > { %v884_v63 = vand.u32 2147483648, %v839_v42  ;;  %v882_v1 = vand.u32 2147483647, %v839_v42  ;;  %v870_v4 = vor.u32 1.1754944e-38, %v869_v60  ;;  %vm878_vm2 = vweird.f32 %v839_v42 }
 0x377   : > { %v891_v47 = vmul.f32 %v1410_v37, %v890_v44  ;;  %1295 = vmatmul.msk.f32.vlgmr.msrb.gmra.mxu2 %vm693_vm1, %v857_v49  ;;  %vm868_vm3 = vcmp.eq.f32.partialorder %v867_v3, 8.507059e+37  ;;  %vm1120_vm7 = vcmask 195584  }
 0x378   : > { %vm883_vm5 = vcmp.eq.f32.partialorder %v882_v1, 8.507059e+37 }
 0x379   : > { %v892_v50 = vadd.f32 %v1410_v37, %v891_v47 }
 0x37a   : > { %v1412_v52 = vpop.eup %1411 }
 0x37b   : > { %v1414_v54 = vpop.eup %1413  ;;  %v896_v51 = vsel %vm895_vm10, %v1410_v37, %v892_v50  ;;  %v859_v55 = vmul.f32 %v1412_v52, %v836_v39  ;;  %vm864_vm12 = vweird.f32 %v1412_v52 }
 0x37c   : > { %v901_v56 = vsel %vm898_vm11, %v900_v53, %v896_v51  ;;  %v874_v57 = vmul.f32 %v1414_v54, %v839_v42  ;;  %vm879_vm13 = vweird.f32 %v1414_v54  ;;  %vm865_vm15 = vmor %vm863_vm14, %vm864_vm12 }
 0x37d   : > { %v860_v58 = vsub.f32 1.0, %v859_v55  ;;  %v902_v59 = vmul.f32 %v1928_v21, %v901_v56  ;;  %vm880_vm4 = vmor %vm878_vm2, %vm879_vm13  ;;  %v885_v21 = vor.u32 1.1754944e-38, %v884_v63 }
 0x37e   : > { %v875_v61 = vsub.f32 1.0, %v874_v57 }
 0x37f   : > { %v861_v62 = vmul.f32 %v1412_v52, %v860_v58  ;;  %1298 = vmatmul.msk.f32.vlgmr.msra.gmra.mxu2 %vm693_vm1, %v902_v59 }
 0x380   : > { %v876_v0 = vmul.f32 %v1414_v54, %v875_v61 }
 0x381   : > { %v862_v2 = vadd.f32 %v1412_v52, %v861_v62 }
 0x382   : > { %v877_v5 = vadd.f32 %v1414_v54, %v876_v0 }
 0x383   : > { %v866_v17 = vsel %vm865_vm15, %v1412_v52, %v862_v2 }
 0x384   : > { %v881_v20 = vsel %vm880_vm4, %v1414_v54, %v877_v5  ;;  %v871_v6 = vsel %vm868_vm3, %v870_v4, %v866_v17 }
 0x385   : > { %v886_v19 = vsel %vm883_vm5, %v885_v21, %v881_v20  ;;  %v872_v7 = vmul.f32 %v1932_v11, %v871_v6 }
 0x386   : > { %v887_v8 = vmul.f32 %v1934_v18, %v886_v19 }
 0x387   : > { %1296 = vmatmul.msk.f32.vlgmr.msrb.gmra.mxu3 %vm693_vm1, %v872_v7 }
 0x388   : > { %1297 = vmatmul.msk.f32.vlgmr.msra.gmra.mxu1 %vm693_vm1, %v887_v8 }
 0x3fa   : > { %v923_v9 = vpop.f32.mrf.mxu2 }
 0x3fb   : > { %v997_v10 = vrot.slane %v923_v9, 4 }
 0x402   : > { %v992_v13 = vpop.f32.mrf.mxu2 }
 0x403   : > { %v1007_v14 = vrot.slane %v992_v13, 4 }
 0x405   : > { %v969_v12 = vpop.f32.mrf.mxu1 }
 0x406   : > { %v995_v15 = vrot.slane %v969_v12, 4  ;;  %v998_v16 = vsel %vm332_vm0, %v969_v12, %v997_v10 }
 0x407   : > { %v1006_v11 = vperm.slane %v998_v16, %v1822_v29  ;;  %v1122_v16 = vld [vmem:[#allocation8] sm:$0xff] }
 0x408   : > { %v996_v22 = vsel %vm332_vm0, %v995_v15, %v923_v9  ;;  %v1124_v15 = vld [vmem:[#allocation8 + $0x10] sm:$0xff] }
 0x409   : > { %v1002_v23 = vperm.slane %v996_v22, %v1822_v29  ;;  %v1033_v30 = vrot.slane %v1006_v11, 4 }
 0x40a   : > { %v946_v24 = vpop.f32.mrf.mxu3 }
 0x40b   : > { %v1008_v18 = vsel %vm332_vm0, %v1007_v14, %v946_v24  ;;  %v1009_v25 = vrot.slane %v946_v24, 4  ;;  %v1021_v26 = vrot.slane %v1002_v23, 4 }
 0x40c   : > { %v1014_v27 = vperm.slane %v1008_v18, %v1822_v29 }
 0x40d   : > { %v1010_v28 = vsel %vm332_vm0, %v992_v13, %v1009_v25  ;;  %v1125_v13 = vld [vmem:[#allocation8 + $0x18] sm:$0xff] }
 0x40e   : > { %v1018_v31 = vperm.slane %v1010_v28, %v1822_v29  ;;  %v1019_v32 = vrot.slane %v1014_v27, 4  ;;  %v1022_v33 = vsel %vm332_vm0, %v1014_v27, %v1021_v26  ;;  %1142 = vmatpush.msra.mxu3 %v1125_v13 }
 0x40f   : > { %v1030_v34 = vperm.slane %v1022_v33, %v1830_v43 }
 0x410   : > { %v1020_v35 = vsel %vm332_vm0, %v1019_v32, %v1002_v23  ;;  %v1031_v36 = vrot.slane %v1018_v31, 4  ;;  %v1034_v37 = vsel %vm332_vm0, %v1018_v31, %v1033_v30  ;;  %1143 = vmatpush.msra.mxu3 %v1124_v15 }
 0x411   : > { %v1026_v38 = vperm.slane %v1020_v35, %v1830_v43  ;;  %v1042_v39 = vperm.slane %v1034_v37, %v1830_v43  ;;  %v1045_v40 = vrot.slane %v1030_v34, 4 }
 0x412   : > { %v1032_v41 = vsel %vm332_vm0, %v1031_v36, %v1006_v11 }
 0x413   : > { %v1038_v42 = vperm.slane %v1032_v41, %v1830_v43  ;;  %v1043_v44 = vrot.slane %v1026_v38, 4  ;;  %v1046_v45 = vsel %vm332_vm0, 0.0, %v1045_v40  ;;  %v1049_v46 = vrot.slane %v1042_v39, 4 }
 0x414   : > { %v1051_v47 = vsel %vm332_vm0, %v1045_v40, %v1026_v38  ;;  %v1056_v48 = vrot.slane %v1046_v45, 4 }
 0x415   : > { %v1044_v49 = vsel %vm332_vm0, 0.0, %v1043_v44  ;;  %v1047_v50 = vrot.slane %v1038_v42, 4  ;;  %v1050_v52 = vsel %vm332_vm0, 0.0, %v1049_v46  ;;  %v1055_v53 = vperm.slane %v1051_v47, %v1822_v29 }
 0x416   : > { %v1067_v54 = vrot.slane %v1050_v52, 4  ;;  %v1057_v51 = vsel %vm332_vm0, %v1056_v48, %v1044_v49  ;;  %v1062_v55 = vsel %vm332_vm0, %v1049_v46, %v1038_v42 }
 0x417   : > { %v1048_v56 = vsel %vm332_vm0, 0.0, %v1047_v50  ;;  %v1061_v57 = vperm.slane %v1057_v51, %v1822_v29  ;;  %v1066_v58 = vperm.slane %v1062_v55, %v1822_v29  ;;  %v1075_v59 = vrot.slane %v1055_v53, 4 }
 0x418   : > { %v1068_v60 = vsel %vm332_vm0, %v1067_v54, %v1048_v56 }
 0x419   : > { %v1072_v61 = vperm.slane %v1068_v60, %v1822_v29  ;;  %v1087_v62 = vrot.slane %v1066_v58, 4  ;;  %v1073_v3 = vrot.slane %v1061_v57, 4  ;;  %v1076_v63 = vsel %vm332_vm0, %v1061_v57, %v1075_v59 }
 0x41a   : > { %v1084_v17 = vperm.slane %v1076_v63, %v1830_v43 }
 0x41b   : > { %v1088_v0 = vsel %vm332_vm0, %v1072_v61, %v1087_v62  ;;  %v1074_v1 = vsel %vm332_vm0, %v1073_v3, %v1055_v53  ;;  %v1085_v2 = vrot.slane %v1072_v61, 4 }
 0x41c   : > { %v1096_v4 = vperm.slane %v1088_v0, %v1830_v43  ;;  %v1080_v5 = vperm.slane %v1074_v1, %v1830_v43  ;;  %v1103_v10 = vrot.slane %v1084_v17, 4 }
 0x41d   : > { %v1086_v21 = vsel %vm332_vm0, %v1085_v2, %v1066_v58 }
 0x41e   : > { %v1101_v20 = vrot.slane %v1096_v4, 4  ;;  %v1092_v29 = vperm.slane %v1086_v21, %v1830_v43  ;;  %v1099_v6 = vrot.slane %v1080_v5, 4  ;;  %v1104_v12 = vsel %vm332_vm0, %v1096_v4, %v1103_v10  ;;  %v1123_v43 = vld [vmem:[#allocation8 + $0x8] sm:$0xff] }
 0x41f   : > { %1144 = vmatpush.msra.mxu3 %v1123_v43 }
 0x420   : > { %v1102_v19 = vsel %vm332_vm0, %v1101_v20, %v1084_v17  ;;  %v1097_v7 = vrot.slane %v1092_v29, 4  ;;  %v1100_v8 = vsel %vm332_vm0, %v1092_v29, %v1099_v6 }
 0x421   : > { %1110 = vrot.lane.b32.xlu0 %v1102_v19, %s1627_s10  ;;  %1106 = vrot.lane.b32.xlu2 %v1100_v8, %s1628_s24 }
 0x422   : > { %v1098_v9 = vsel %vm332_vm0, %v1097_v7, %v1080_v5  ;;  %1145 = vmatpush.msra.mxu3 %v1122_v16  ;;  %vm1126_vm0 = vcmask 261120  }
 0x429   : > { %1114 = vrot.lane.b32.xlu2 %v1104_v12, %s1629_s25 }
 0x47b   : > { %v1107_v22 = vpop.permute.xlu2 %1106 }
 0x47c   : > { %v1117_v14 = vsel %vm693_vm1, %v1098_v9, %v1107_v22 }
 0x483   : > { %v1115_v11 = vpop.permute.xlu2 %1114 }
 0x493   : > { %v1111_v23 = vpop.permute.xlu0 %1110 }
 0x494   : > { %v1119_v24 = vsel %vm1118_vm6, %v1117_v14, %v1111_v23 }
 0x495   : > { %v1121_v18 = vsel %vm1120_vm7, %v1119_v24, %v1115_v11 }
 0x496   : > { %1299 = vmatmul.msk.f32.vlgmr.msra.gmra.mxu3 %vm1126_vm0, %v1121_v18 }
 0x519   : > { %v1147_v25 = vpop.f32.mrf.mxu3 }
 0x51a   : > { %1150 = vst [vmem:[%s282_s6] sm:$0xff] %v1147_v25 }
 0x51b   : > { %1562 = shalt.err (!%p1559_p8)
}
 0x51c   : > { %1316 = dma.vmem_to_hbm [thread:$0]  (%p1726_p4), %s1165_s27, 128, %s1167_s3, %s1152_s23  }
 0x51d PF: > { %s1178_s2 = sand.u32 1, %s1601_s15   ;;  %p2079_p10 = scmp.ge.s32.totalorder %s1613_s18, 2 }
 0x51e   : > { %s1179_s9 = scalar_lea.sflag [#allocation4], %s1178_s2 }
 0x51f   : > { %p1333_p13 = pnand %p2079_p10, %p1730_p6 }
 0x521   : > { %p1334_p11 = pneg %p1333_p13 }
 0x523   : > { %1596 = dma.done.wait (%p1334_p11), %s1179_s9, 128  }
 0x524   : > { %1598 = vsyncadd (%p1334_p11), %s1179_s9, 4294967168  ;;  %p21_p0 = scmp.ge.s32.totalorder %s1698_s8, 4   ;;  %s2080_s15 = smov %s1605_s16 }
 0x525   : > { %s2081_s16 = smov %s1609_s17  ;;  %s2082_s17 = smov %s1709_s11 }
 0x526   : > { %s2083_s18 = smov %s1698_s8  ;;  %23 = sbr.rel (!%p21_p0) target bundleno = 11 (0xb), region = 102 }
 0x52b   :  { %1185 = vsyncpa [#allocation3], 1 }
 0x52c   :  { %1187 = vsyncpa [#allocation3 + $0x1], 1 }
 0x52d   :  { %1188 = vsyncpa [#allocation6], 1 }
 0x52e   :  { %1190 = vsyncpa [#allocation6 + $0x1], 1 }
 0x52f   :  { %1191 = vsyncpa [#allocation9], 1 }
 0x530   :  { %1192 = vsyncpa [#allocation4], 1 }
 0x531   :  { %1194 = vsyncpa [#allocation4 + $0x1], 1 }

</bundles_post_ra>
